<compile_context>
chip_gen: v7x
topology: tpu7x:2x2x1
jax: 0.10.0
libtpu: 0.0.40
codegen_flags: <defaults>
</compile_context>

<pallas_src>
import functools

import jax
import jax.numpy as jnp
from jax.experimental import pallas as pl
from jax.experimental.pallas import tpu as pltpu


def _round_up(x, m):
    return ((x + m - 1) // m) * m


def _cdiv(a, b):
    return (a + b - 1) // b


@functools.lru_cache(maxsize=None)
def _device_kind():
    try:
        return jax.devices()[0].device_kind.lower()
    except Exception:  # pragma: no cover - defensive
        return ""


@functools.lru_cache(maxsize=None)
def _single_buffer_supported():
    """Probe whether pipeline_mode=pl.Buffered(1) lowers/compiles on this backend."""
    def _probe_kernel(x_ref, o_ref):
        o_ref[...] = x_ref[...]

    try:
        x = jnp.zeros((8, 128), jnp.float32)
        fn = pl.pallas_call(
            _probe_kernel,
            out_shape=jax.ShapeDtypeStruct((8, 128), jnp.float32),
            grid=(1,),
            in_specs=[pl.BlockSpec((8, 128), lambda i: (0, 0),
                                   pipeline_mode=pl.Buffered(1))],
            out_specs=pl.BlockSpec((8, 128), lambda i: (0, 0)),
        )
        jax.jit(fn).lower(x).compile()
        return True
    except Exception:
        return False


def _ntx_poly_tile_kernel(lhs_ref, partner_ref, allxt_ref, out_ref, *,
                          inv_temperature, batch, half_pad, n_pad, tile_rows,
                          is_cosine, use_bf16_exp):
    # lhs_ref:     (TILE, D)      rows of this tile                  (matmul dtype)
    # partner_ref: (TILE, D)      matching rows of the other half    (matmul dtype)
    # allxt_ref:   (D, N_pad)     all rows, pre-transposed, resident (matmul dtype)
    # out_ref:     (TILE, 128)    f32; lane 0 = CE term, lane 1 = softmax@0 term
    t = pl.program_id(0)

    lhs = lhs_ref[...]
    # Fold 1/T into the small (TILE, D) operand instead of the (TILE, N) slab.
    lhs_scaled = lhs * jnp.asarray(inv_temperature, dtype=lhs.dtype)
    lhs_scaled_f32 = lhs_scaled.astype(jnp.float32)

    # Plain (M,K)@(K,N) MXU matmul against the pre-transposed resident operand;
    # f32 accumulation, no per-step transpose of the big operand.
    logits = jnp.dot(lhs_scaled, allxt_ref[...],
                     preferred_element_type=jnp.float32)          # (TILE, N_pad)

    # Positive (class-0) logit: row-wise dot with the partner rows.
    pos = jnp.sum(lhs_scaled_f32 * partner_ref[...].astype(jnp.float32),
                  axis=-1, keepdims=True)                         # (TILE, 1)

    num_pad_cols = n_pad - 2 * batch                              # static python int

    if is_cosine:
        # |logits| <= 1/T for normalized rows, so the unmasked row max is a
        # valid logsumexp shift (shift invariance) -- no masking pass needed.
        shift = jnp.max(logits, axis=-1, keepdims=True)
        z = logits - shift
        if use_bf16_exp:
            exps = jnp.exp(z.astype(jnp.bfloat16))                # EUP bf16 slab pass
        else:
            exps = jnp.exp(z)
        sum_exp = jnp.sum(exps, axis=-1, keepdims=True, dtype=jnp.float32)

        # Closed-form exclusion (replaces the slab-wide iota/compare/where):
        #  * the diagonal logit equals the row's self-dot (computed in f32 on
        #    the VPU so it matches the MXU value),
        #  * each zero-padded column contributes exactly exp(-shift).
        diag = jnp.sum(lhs_scaled_f32 * lhs.astype(jnp.float32),
                       axis=-1, keepdims=True)
        sum_exp = sum_exp - jnp.exp(diag - shift)
        if num_pad_cols:
            sum_exp = sum_exp - jnp.float32(num_pad_cols) * jnp.exp(-shift)
        sum_exp = jnp.maximum(sum_exp, jnp.float32(1e-30))
    else:
        # Unbounded dot-similarity logits: keep the explicit diagonal/padding
        # mask and a masked shift, all in f32.
        col = jax.lax.broadcasted_iota(jnp.int32, logits.shape, 1)
        diag_col = (t * tile_rows
                    + jax.lax.broadcasted_iota(jnp.int32, (tile_rows, 1), 0))
        excluded = col == diag_col
        if num_pad_cols:
            in_second_half = col >= half_pad
            col_in_half = col - jnp.where(in_second_half, half_pad, 0)
            excluded = excluded | (col_in_half >= batch)
        masked = jnp.where(excluded, jnp.float32(-1e30), logits)
        shift = jnp.max(masked, axis=-1, keepdims=True)
        sum_exp = jnp.sum(jnp.exp(masked - shift), axis=-1, keepdims=True)

    lse = shift + jnp.log(sum_exp)
    ce_terms = lse - pos                                          # per-row CE
    # softmax(logits)[r, 0] = exp(pos - shift) / sum_exp  (EUP approx recip).
    sm_terms = jnp.exp(pos - shift) * pl.reciprocal(sum_exp, approx=True)

    # Lane-dense output block: lane 0 = CE term, lane 1 = softmax@0 term.
    lane = jax.lax.broadcasted_iota(jnp.int32, (tile_rows, 128), 1)
    out = jnp.where(lane == 0, ce_terms, jnp.float32(0.0))
    out = jnp.where(lane == 1, sm_terms, out)
    out_ref[...] = out


def ntxent_loss_poly(data_i, data_j, temperature=0.2, is_cosine=True,
                     matmul_dtype=None, tile_rows=None):
    """Pallas TPU implementation of NTXentLossPoly.forward."""
    assert data_i.ndim == 2 and data_i.shape == data_j.shape
    batch, feat = data_i.shape

    kind = _device_kind()
    is_v5 = "v5" in kind
    is_v6 = "v6" in kind
    is_v7 = ("v7" in kind) or ("tpu7" in kind)
    vmem_phys = (64 if is_v7 else 128) * 1024 * 1024

    if matmul_dtype is None:
        # Cosine-normalized features in [-1, 1] are safe as bf16 MXU operands
        # (f32 accumulation); raw dot-similarity stays in f32.
        matmul_dtype = jnp.bfloat16 if is_cosine else jnp.float32
    if (not is_cosine) and jnp.dtype(matmul_dtype) == jnp.dtype(jnp.bfloat16):
        # Unbounded logits are unsafe with bf16 operands; force f32.
        matmul_dtype = jnp.float32
    itemsize = jnp.dtype(matmul_dtype).itemsize

    # bf16 slab-exp is a ~2x EUP win on v6e/v7x; keep f32 elsewhere (v5e etc.).
    use_bf16_exp = bool(is_cosine) and (is_v6 or is_v7)

    single_buffer = _single_buffer_supported()
    resident_bufs = 1 if single_buffer else 2

    # ---- Row tiling: minimize padding while targeting the MXU M-dim. ----
    target = 128 if is_v5 else 256

    def _layout(tr):
        tr = max(8, min(_round_up(tr, 8), _round_up(batch, 8)))
        tiles_per_half = _cdiv(batch, tr)
        tr = _round_up(_cdiv(batch, tiles_per_half), 8)   # shrink -> less padding
        hp = tr * tiles_per_half
        npad = 2 * hp
        need = (feat * npad * itemsize * resident_bufs    # resident xn^T
                + 2 * 2 * tr * feat * itemsize            # lhs + partner streams
                + 2 * tr * 128 * 4                        # output blocks
                + 4 * tr * npad * 4)                      # slab temporaries
        return tr, hp, npad, need

    if tile_rows is not None:
        tile_rows, half_pad, n_pad, need = _layout(tile_rows)
    else:
        budget = vmem_phys - 20 * 1024 * 1024
        tile_rows, half_pad, n_pad, need = _layout(target)
        while need > budget and tile_rows > 8:
            tile_rows, half_pad, n_pad, need = _layout(tile_rows // 2)

    num_tiles = n_pad // tile_rows            # even by construction
    half_tiles = num_tiles // 2

    vmem_cap = (44 if is_v7 else 100) * 1024 * 1024
    vmem_limit = int(min(vmem_cap,
                         max(32 * 1024 * 1024, need + 16 * 1024 * 1024)))

    # O(N*D) prep: rsqrt normalization, cast, zero-pad each half, pack halves,
    # plus a one-time transpose for the resident matmul operand.
    def _prep(v):
        v = v.astype(jnp.float32)
        if is_cosine:
            ssq = jnp.sum(v * v, axis=-1, keepdims=True)
            # torch CosineSimilarity-style eps clamp (per-row norm >= 1e-8).
            v = v * jax.lax.rsqrt(jnp.maximum(ssq, jnp.float32(1e-16)))
        v = v.astype(matmul_dtype)
        if half_pad != batch:
            v = jnp.pad(v, ((0, half_pad - batch), (0, 0)))
        return v

    xn = jnp.concatenate([_prep(data_i), _prep(data_j)], axis=0)   # (n_pad, D)
    xnt = xn.T                                                     # (D, n_pad)

    kernel = functools.partial(
        _ntx_poly_tile_kernel,
        inv_temperature=float(1.0 / temperature),
        batch=batch, half_pad=half_pad, n_pad=n_pad, tile_rows=tile_rows,
        is_cosine=bool(is_cosine), use_bf16_exp=use_bf16_exp)

    resident_kwargs = {}
    if single_buffer:
        resident_kwargs["pipeline_mode"] = pl.Buffered(1)

    in_specs = [
        # Rows of this tile.
        pl.BlockSpec((tile_rows, feat), lambda t: (t, 0)),
        # Partner rows (matching rows of the other half).
        pl.BlockSpec((tile_rows, feat),
                     lambda t: ((t + half_tiles) % num_tiles, 0)),
        # All rows, pre-transposed, resident across the grid (single-buffered).
        pl.BlockSpec((feat, n_pad), lambda t: (0, 0), **resident_kwargs),
    ]

    partials = pl.pallas_call(
        kernel,
        out_shape=jax.ShapeDtypeStruct((n_pad, 128), jnp.float32),
        grid_spec=pltpu.PrefetchScalarGridSpec(
            num_scalar_prefetch=0,
            grid=(num_tiles,),
            in_specs=in_specs,
            out_specs=pl.BlockSpec((tile_rows, 128), lambda t: (t, 0)),
        ),
        compiler_params=pltpu.CompilerParams(
            dimension_semantics=("parallel",),
            vmem_limit_bytes=vmem_limit,
        ),
    )(xn, xn, xnt)

    # Tiny final reduction over the real (unpadded) rows only.
    ce_sum = (partials[:batch, 0].sum()
              + partials[half_pad:half_pad + batch, 0].sum())
    sm_sum = (partials[:batch, 1].sum()
              + partials[half_pad:half_pad + batch, 1].sum())
    n = 2 * batch
    # loss = CE/(2B) + B*(1/B - poly),  poly = sm_sum / (2B*(2B-1))
    return ce_sum / n + 1.0 - sm_sum / (2.0 * (n - 1))


def _reference_loss(data_i, data_j, temperature=0.2, is_cosine=True):
    """Pure-JAX f32 reference mirroring the PyTorch math (for validation)."""
    b = data_i.shape[0]
    x = jnp.concatenate([data_i, data_j], axis=0).astype(jnp.float32)
    n = 2 * b
    if is_cosine:
        norm = jnp.maximum(jnp.linalg.norm(x, axis=-1, keepdims=True), 1e-8)
        xn = x / norm
    else:
        xn = x
    sim = jnp.dot(xn, xn.T, precision=jax.lax.Precision.HIGHEST)
    logits = sim / temperature
    diag = jnp.eye(n, dtype=bool)
    partner = jnp.roll(jnp.eye(n, dtype=bool), b, axis=1)
    masked = jnp.where(diag, -jnp.inf, logits)
    lse = jax.scipy.special.logsumexp(masked, axis=-1)
    pos = jnp.sum(jnp.where(partner, logits, 0.0), axis=-1)
    ce = jnp.sum(lse - pos)
    softmax0 = jnp.sum(jnp.exp(pos - lse))
    return ce / n + 1.0 - softmax0 / (2.0 * (n - 1))


if __name__ == "__main__":
    key = jax.random.PRNGKey(0)
    k1, k2, k3, k4 = jax.random.split(key, 4)

    # Tolerance is dominated by bf16 MXU operands, the bf16 slab exponential
    # (v6e/v7x) and the approx EUP reciprocal; any real masking/tiling bug is
    # orders of magnitude larger than this.
    TOL = 2.5e-2

    # Small case (B=4, D=32): exercises padded rows/columns (B rounded up to 8)
    # and the 2-tile partner indexing.
    di = jax.random.normal(k1, (4, 32), dtype=jnp.float32)
    dj = jax.random.normal(k2, (4, 32), dtype=jnp.float32)
    ref = jax.block_until_ready(_reference_loss(di, dj))

    loss_bf16 = jax.block_until_ready(jax.jit(ntxent_loss_poly)(di, dj))
    assert jnp.allclose(loss_bf16, ref, rtol=TOL, atol=TOL), (loss_bf16, ref)

    f32_fn = jax.jit(functools.partial(ntxent_loss_poly,
                                       matmul_dtype=jnp.float32))
    loss_f32 = jax.block_until_ready(f32_fn(di, dj))
    assert jnp.allclose(loss_f32, ref, rtol=TOL, atol=TOL), (loss_f32, ref)

    # Multi-tile case (B=160, D=64): adaptive row tiling (320-wide slab instead
    # of 512), partner tiles crossing the half boundary.
    di2 = jax.random.normal(k3, (160, 64), dtype=jnp.float32)
    dj2 = jax.random.normal(k4, (160, 64), dtype=jnp.float32)
    ref2 = jax.block_until_ready(_reference_loss(di2, dj2))
    loss2 = jax.block_until_ready(jax.jit(ntxent_loss_poly)(di2, dj2))
    assert jnp.allclose(loss2, ref2, rtol=TOL, atol=TOL), (loss2, ref2)

    print("KERNEL_OK")
</pallas_src>

<mosaic_0001>
module attributes {stable_mosaic.version = 11 : i64} {
  func.func @_ntx_poly_tile_kernel(%arg0: i32, %arg1: memref<8x32xbf16, #tpu.memory_space<vmem>>, %arg2: memref<8x32xbf16, #tpu.memory_space<vmem>>, %arg3: memref<32x16xbf16, #tpu.memory_space<vmem>>, %arg4: memref<8x128xf32, #tpu.memory_space<vmem>>) attributes {dimension_semantics = [#tpu.dimension_semantics<parallel>], iteration_bounds = array<i64: 2>, scalar_prefetch = 0 : i64, scratch_operands = 0 : i64, tpu.core_type = #tpu.core_type<tc>, window_params = [{transform_indices = @transform_0, window_bounds = array<i64: 8, 32>}, {transform_indices = @transform_1, window_bounds = array<i64: 8, 32>}, {pipeline_mode = #tpu.pipeline_mode<synchronous>, transform_indices = @transform_2, window_bounds = array<i64: 32, 16>}, {transform_indices = @transform_3, window_bounds = array<i64: 8, 128>}]} {
    %c0 = arith.constant 0 : index
    %c0_0 = arith.constant 0 : index
    %0 = vector.load %arg1[%c0, %c0_0] : memref<8x32xbf16, #tpu.memory_space<vmem>>, vector<8x32xbf16>
    %cst = arith.constant 5.000000e+00 : bf16
    %1 = vector.broadcast %cst : bf16 to vector<8x32xbf16>
    %2 = arith.mulf %0, %1 : vector<8x32xbf16>
    %3 = arith.extf %2 : vector<8x32xbf16> to vector<8x32xf32>
    %c0_1 = arith.constant 0 : index
    %c0_2 = arith.constant 0 : index
    %4 = vector.load %arg3[%c0_1, %c0_2] : memref<32x16xbf16, #tpu.memory_space<vmem>>, vector<32x16xbf16>
    %cst_3 = arith.constant dense<0.000000e+00> : vector<8x16xf32>
    %5 = tpu.matmul %2, %4, %cst_3 {dimension_numbers = #tpu.dot_dimension_numbers<[1], [0], [0], [1], [0, 0, 1, 1], [], []>} : vector<8x32xbf16>, vector<32x16xbf16>, vector<8x16xf32> -> vector<8x16xf32>
    %c0_4 = arith.constant 0 : index
    %c0_5 = arith.constant 0 : index
    %6 = vector.load %arg2[%c0_4, %c0_5] : memref<8x32xbf16, #tpu.memory_space<vmem>>, vector<8x32xbf16>
    %7 = arith.extf %6 : vector<8x32xbf16> to vector<8x32xf32>
    %8 = arith.mulf %3, %7 : vector<8x32xf32>
    %cst_6 = arith.constant dense<0.000000e+00> : vector<8xf32>
    %9 = vector.multi_reduction <add>, %8, %cst_6 [1] : vector<8x32xf32> to vector<8xf32>
    %10 = vector.shape_cast %9 : vector<8xf32> to vector<8x1xf32>
    %cst_7 = arith.constant dense<0xFF800000> : vector<8xf32>
    %11 = vector.multi_reduction <maximumf>, %5, %cst_7 [1] : vector<8x16xf32> to vector<8xf32>
    %12 = vector.shape_cast %11 : vector<8xf32> to vector<8x1xf32>
    %13 = vector.broadcast %12 : vector<8x1xf32> to vector<8x16xf32>
    %14 = arith.subf %5, %13 : vector<8x16xf32>
    %15 = math.exp %14 : vector<8x16xf32>
    %cst_8 = arith.constant dense<0.000000e+00> : vector<8xf32>
    %16 = vector.multi_reduction <add>, %15, %cst_8 [1] : vector<8x16xf32> to vector<8xf32>
    %17 = vector.shape_cast %16 : vector<8xf32> to vector<8x1xf32>
    %18 = arith.extf %0 : vector<8x32xbf16> to vector<8x32xf32>
    %19 = arith.mulf %3, %18 : vector<8x32xf32>
    %cst_9 = arith.constant dense<0.000000e+00> : vector<8xf32>
    %20 = vector.multi_reduction <add>, %19, %cst_9 [1] : vector<8x32xf32> to vector<8xf32>
    %21 = vector.shape_cast %20 : vector<8xf32> to vector<8x1xf32>
    %22 = arith.subf %21, %12 : vector<8x1xf32>
    %23 = math.exp %22 : vector<8x1xf32>
    %24 = arith.subf %17, %23 : vector<8x1xf32>
    %cst_10 = arith.constant 0.000000e+00 : f32
    %25 = vector.broadcast %cst_10 : f32 to vector<8x1xf32>
    %26 = arith.subf %25, %12 : vector<8x1xf32>
    %27 = math.exp %26 : vector<8x1xf32>
    %cst_11 = arith.constant 8.000000e+00 : f32
    %28 = vector.broadcast %cst_11 : f32 to vector<8x1xf32>
    %29 = arith.mulf %28, %27 : vector<8x1xf32>
    %30 = arith.subf %24, %29 : vector<8x1xf32>
    %cst_12 = arith.constant 1.000000e-30 : f32
    %31 = vector.broadcast %cst_12 : f32 to vector<8x1xf32>
    %32 = arith.maximumf %30, %31 : vector<8x1xf32>
    %33 = math.log %32 : vector<8x1xf32>
    %34 = arith.addf %12, %33 : vector<8x1xf32>
    %35 = arith.subf %34, %10 : vector<8x1xf32>
    %36 = arith.subf %10, %12 : vector<8x1xf32>
    %37 = math.exp %36 : vector<8x1xf32>
    %38 = tpu.reciprocal %32 {approx = true} : vector<8x1xf32> -> vector<8x1xf32>
    %39 = arith.mulf %37, %38 : vector<8x1xf32>
    %40 = tpu.iota {dimensions = array<i32: 1>} : vector<8x128xi32>
    %c0_i32 = arith.constant 0 : i32
    %41 = vector.broadcast %c0_i32 : i32 to vector<8x128xi32>
    %42 = arith.cmpi eq, %40, %41 : vector<8x128xi32>
    %cst_13 = arith.constant 0.000000e+00 : f32
    %43 = vector.shape_cast %35 : vector<8x1xf32> to vector<8x1xf32>
    %44 = vector.broadcast %43 : vector<8x1xf32> to vector<8x128xf32>
    %45 = vector.broadcast %cst_13 : f32 to vector<8x128xf32>
    %46 = arith.select %42, %44, %45 : vector<8x128xi1>, vector<8x128xf32>
    %c1_i32 = arith.constant 1 : i32
    %47 = vector.broadcast %c1_i32 : i32 to vector<8x128xi32>
    %48 = arith.cmpi eq, %40, %47 : vector<8x128xi32>
    %49 = vector.shape_cast %39 : vector<8x1xf32> to vector<8x1xf32>
    %50 = vector.broadcast %49 : vector<8x1xf32> to vector<8x128xf32>
    %51 = arith.select %48, %50, %46 : vector<8x128xi1>, vector<8x128xf32>
    %c0_14 = arith.constant 0 : index
    %c0_15 = arith.constant 0 : index
    %52 = vector.load %arg4[%c0_14, %c0_15] : memref<8x128xf32, #tpu.memory_space<vmem>>, vector<8x128xf32>
    tpu.vector_store %arg4[%c0_14, %c0_15], %51 {strides = array<i32>} : memref<8x128xf32, #tpu.memory_space<vmem>>, vector<8x128xf32>,
    return
  }
  func.func @transform_0(%arg0: i32) -> (i32, i32) {
    %c0_i32 = arith.constant 0 : i32
    %c0_i32_0 = arith.constant 0 : i32
    return %arg0, %c0_i32 : i32, i32
  }
  func.func @transform_1(%arg0: i32) -> (i32, i32) {
    %c1_i32 = arith.constant 1 : i32
    %0 = arith.addi %arg0, %c1_i32 : i32
    %c2_i32 = arith.constant 2 : i32
    %c0_i32 = arith.constant 0 : i32
    %1 = arith.cmpi eq, %c2_i32, %c0_i32 : i32
    %c1_i32_0 = arith.constant 1 : i32
    %2 = arith.select %1, %c1_i32_0, %c2_i32 : i32
    %3 = arith.remsi %0, %2 : i32
    %c0_i32_1 = arith.constant 0 : i32
    %4 = arith.cmpi ne, %3, %c0_i32_1 : i32
    %c0_i32_2 = arith.constant 0 : i32
    %5 = arith.cmpi slt, %3, %c0_i32_2 : i32
    %c0_i32_3 = arith.constant 0 : i32
    %6 = arith.cmpi slt, %2, %c0_i32_3 : i32
    %7 = arith.xori %5, %6 : i1
    %8 = arith.andi %7, %4 : i1
    %9 = arith.addi %3, %2 : i32
    %10 = arith.select %8, %9, %3 : i32
    %c0_i32_4 = arith.constant 0 : i32
    %c0_i32_5 = arith.constant 0 : i32
    return %10, %c0_i32_4 : i32, i32
  }
  func.func @transform_2(%arg0: i32) -> (i32, i32) {
    %c0_i32 = arith.constant 0 : i32
    %c0_i32_0 = arith.constant 0 : i32
    %c0_i32_1 = arith.constant 0 : i32
    return %c0_i32, %c0_i32_0 : i32, i32
  }
  func.func @transform_3(%arg0: i32) -> (i32, i32) {
    %c0_i32 = arith.constant 0 : i32
    %c0_i32_0 = arith.constant 0 : i32
    return %arg0, %c0_i32 : i32, i32
  }
}

</mosaic_0001>

<bundles_post_ra>
// kernel: ntxent_loss_poly.1
= control target key start
LH: loop header
LB: loop body
LE: loop exit
PB: predicated region body
PF: predicated region fallthrough
CT: control target
= control target key end

     0   :  { %s538_s12 = smov 0   ;;  %s578_s0 = inlined_call_operand.vmem [shape: bf16[16,32], index: 0, kind: input, shape index: {}, may-alias: {0,1}]   ;;  %s579_s1 = inlined_call_operand.vmem [shape: bf16[16,32], index: 1, kind: input, shape index: {}, may-alias: {0,1}]   ;;  %s580_s2 = inlined_call_operand.vmem [shape: bf16[32,16], index: 2, kind: input, shape index: {}]   ;;  %s581_s3 = inlined_call_operand.vmem [shape: f32[16,128], index: 3, kind: output, shape index: {}]  }
   0x1 LB: > { %s544_s13 = sadd.s32 4294967295, %s514_s12   ;;  %p461_p0 = scmp.ge.s32.totalorder %s514_s12, 1  ;;  %s514_s12 = sphi %s538_s12, %s13_s12  }
   0x2   : > { %p197_p1 = scmp.lt.s32.totalorder %s514_s12, 3 }
   0x4   : > { %p198_p2 = pnand %p461_p0, %p197_p1 }
   0x5   : > { %v494_v0 = vld [vmem:[%s580_s2] sm:$0xff] (!%p198_p2)   ;;  %v516_v1 = vmov (!%p198_p2), 0.0   ;;  %v495_v2 = vld [vmem:[%s580_s2 + $0x8] sm:$0xff] (!%p198_p2)   ;;  %vm517_vm0 = vmmov (!%p198_p2), 0   ;;  %p236_p3 = scmp.lt.s32.totalorder (!%p198_p2), %s544_s13, 1  ;;  %vm295_vm1 = vcmask (!%p198_p2), 261120   ;;  %v379_v38 = vlaneseq (!%p198_p2) }
   0x6   : > { %201 = sbr.rel (%p198_p2) target bundleno = 559 (0x22f), region = 32  ;;  %476 = vmatprep.subr.bf16.mxu0 (!%p198_p2), %v516_v1  ;;  %480 = vmatprep.mubr.msk.bf16.mxu0 (!%p198_p2), %vm517_vm0, %v516_v1  ;;  %vm345_vm2 = vcmask (!%p198_p2), 130048   ;;  %s240_s23 = sadd.s32 (!%p198_p2), 1, %s544_s13 }
   0x7   : > { %477 = vmatpush3.bf16.msra.mxu0 (!%p198_p2), %v494_v0  ;;  %s242_s24 = ssub.s32 (!%p198_p2), 0, %s240_s23  ;;  %p241_p4 = scmp.lt.s32.totalorder (!%p198_p2), %s240_s23, 0  ;;  %v380_v40 = vand.u32 (!%p198_p2), 127, %v379_v38 }
   0x8   : > { %478 = vmatprep.subr.bf16.mxu0 (!%p198_p2), %v516_v1  ;;  %s463_s25 = smin.u32 (!%p198_p2), %s242_s24, %s240_s23 }
   0x9   : > { %s244_s26 = sand.u32 (!%p198_p2), 1, %s463_s25   ;;  %vm381_vm3 = vcmp.eq.s32.totalorder (!%p198_p2), %v380_v40, 0  ;;  %vm383_vm4 = vcmp.eq.s32.totalorder (!%p198_p2), %v380_v40, 1 }
   0xa   : > { %s245_s27 = ssub.s32 (!%p198_p2), 0, %s244_s26 }
   0xb   : > { %479 = vmatpush3.bf16.msra.mxu0 (!%p198_p2), %v495_v2 }
   0xd   : > { %s556_s18 = scalar_select %p236_p3, %s544_s13, 1 }
   0xe   : > { %s583_s27 = smov (!%p241_p4, %s245_s27), %s244_s26 }
   0xf   : > { %s462_s19 = sshll.u32 %s556_s18, 2  ;;  %p465_p5 = scmp.lt.s32.totalorder %s583_s27, 0 }
  0x10   : > { %s239_s22 = scalar_lea.vmem %s578_s0, %s462_s19  ;;  %s251_s28 = sadd.s32 2, %s583_s27 }
  0x11   : > { %v276_v3 = vld [vmem:[%s239_s22] sm:$0xf]  ;;  %s585_s28 = smov (!%p465_p5, %s251_s28), %s583_s27  ;;  %s467_s6 = sshll.u32 %s556_s18, 3 }
  0x12   : > { %v277_v4 = vmul.bf16 1084244128, %v276_v3  ;;  %v355_v6 = vunpack.c.l.bf16 %v276_v3  ;;  %p253_p6 = scmp.lt.s32.totalorder %s585_s28, 1  ;;  %s273_s9 = scalar_lea.vmem %s581_s3, %s467_s6 }
  0x14   : > { %481 = vmatmul.mubr.msk.bf16.vlgmr.msra.gmra.mrb[0].mxu0 %vm295_vm1, %v277_v4  ;;  %v278_v5 = vunpack.c.l.bf16 %v277_v4  ;;  %s587_s28 = smov (!%p253_p6, %s585_s28), 1 }
  0x15   : > { %s466_s29 = sshll.u32 %s587_s28, 2 }
  0x16   : > { %v356_v7 = vmul.f32 %v355_v6, %v278_v5  ;;  %s256_s5 = scalar_lea.vmem %s579_s1, %s466_s29 }
  0x17   : > { %v339_v17 = vld [vmem:[%s256_s5] sm:$0xf] }
  0x18   : > { %v357_v13 = vsel %vm295_vm1, %v356_v7, 0.0  ;;  %v340_v18 = vunpack.c.l.bf16 %v339_v17 }
  0x1a   : > { %v341_v19 = vmul.f32 %v340_v18, %v278_v5 }
  0x1c   : > { %v342_v22 = vsel %vm295_vm1, %v341_v19, 0.0 }
  0xe7   : > { %v333_v8 = vpop.f32.mrb[0].mxu0 }
  0xe8   : > { %v482_v9 = vpop.f32.mrb[1].mxu0  ;;  %v346_v10 = vsel %vm345_vm2, %v333_v8, -inf }
  0xe9   : > { %347 = vmax.xlane.f32.xlu0 %v346_v10  ;;  %v336_v11 = vpop.f32.mrb[2].mxu0 }
  0xea   : > { %v483_v12 = vpop.f32.mrb[3].mxu0 }
  0xed   : > { %358 = vadd.xlane.f32.xlu0 %v357_v13 }
 0x176   : > { %v348_v14 = vpop.xlane.xlu0 %347 }
 0x177   : > { %v349_v15 = vsub.f32 %v333_v8, %v348_v14  ;;  %v364_v24 = vsub.f32 0.0, %v348_v14 }
 0x179   : > { %v350_v16 = vmul.f32 1.442695, %v349_v15  ;;  %v365_v26 = vmul.f32 1.442695, %v364_v24 }
 0x17a   : > { %v359_v23 = vpop.xlane.xlu0 %358 }
 0x17b   : > { %496 = vpow2.f32 %v350_v16  ;;  %v360_v25 = vsub.f32 %v359_v23, %v348_v14 }
 0x17c   : > { %498 = vpow2.f32 %v365_v26 }
 0x17d   : > { %v361_v27 = vmul.f32 1.442695, %v360_v25 }
 0x17f   : > { %500 = vpow2.f32 %v361_v27 }
 0x185   : > { %v497_v20 = vpop.eup %496 }
 0x186   : > { %v352_v21 = vsel %vm345_vm2, %v497_v20, 0.0  ;;  %v499_v28 = vpop.eup %498 }
 0x187   : > { %353 = vadd.xlane.f32.xlu1 %v352_v21  ;;  %v367_v31 = vmul.f32 8.0, %v499_v28 }
 0x189   : > { %v501_v29 = vpop.eup %500 }
 0x18b   : > { %343 = vadd.xlane.f32.xlu1 %v342_v22 }
 0x214   : > { %v354_v30 = vpop.xlane.xlu1 %353 }
 0x215   : > { %v363_v32 = vsub.f32 %v354_v30, %v501_v29 }
 0x217   : > { %v368_v33 = vsub.f32 %v363_v32, %v367_v31 }
 0x218   : > { %v344_v34 = vpop.xlane.xlu1 %343 }
 0x219   : > { %v369_v35 = vmax.f32 %v368_v33, 1e-30  ;;  %v374_v36 = vsub.f32 %v344_v34, %v348_v14 }
 0x21b   : > { %502 = vlog2.f32 %v369_v35  ;;  %v375_v37 = vmul.f32 1.442695, %v374_v36 }
 0x21d   : > { %504 = vpow2.f32 %v375_v37 }
 0x21e   : > { %506 = vrcp.f32 %v369_v35 }
 0x225   : > { %v503_v39 = vpop.eup %502 }
 0x226   : > { %v371_v41 = vmul.f32 0.6931472, %v503_v39 }
 0x227   : > { %v505_v42 = vpop.eup %504 }
 0x228   : > { %v372_v43 = vadd.f32 %v371_v41, %v348_v14  ;;  %v507_v44 = vpop.eup %506 }
 0x229   : > { %v378_v46 = vmul.f32 %v507_v44, %v505_v42 }
 0x22a   : > { %v373_v45 = vsub.f32 %v372_v43, %v344_v34 }
 0x22c   : > { %v382_v47 = vsel %vm381_vm3, %v373_v45, 0.0 }
 0x22d   : > { %v384_v48 = vsel %vm383_vm4, %v378_v46, %v382_v47 }
 0x22e   : > { %385 = vst [vmem:[%s273_s9] sm:$0xff] %v384_v48 }
 0x22f PF: > { %s13_s12 = sadd.s32 1, %s514_s12  }
 0x230   : > { %p10_p7 = scmp.ge.s32.totalorder %s13_s12, 4  }
 0x232   :  { %12 = sbr.rel (!%p10_p7) target bundleno = 1 (0x1), region = 65 }

</bundles_post_ra>
